<compile_context>
chip_gen: v7x
topology: tpu7x:2x2x1
jax: 0.10.0
libtpu: 0.0.40
codegen_flags: <defaults>
</compile_context>

<pallas_src>
import functools

import jax
import jax.numpy as jnp
import numpy as np
from jax.experimental import pallas as pl
from jax.experimental.pallas import tpu as pltpu

_LANE_TARGET = 2048  # aim for >= ~2048-lane tiles per grid step (HBM roofline)


# ----------------------------- Pallas kernel --------------------------------
def simplest_cnn_kernel(x_ref, wtap_ref, bconv_ref, mask_ref,
                        w1_ref, b1_ref, w2_ref, b2_ref, out_ref, *, width):
    # x_ref    : (Bb, Cin, HW)   raw input block, HW on lanes
    # wtap_ref : (9, Cout, Cin)  conv taps, index kh*3+kw
    # bconv_ref: (1, Cout, 1)
    # mask_ref : (10, 1, HW)     9 tap-validity masks (padding=1) + even-(h,w) pool mask
    # w1_ref   : (Cout, 64)  = fc1_w.T ;  b1_ref : (1, 64)
    # w2_ref   : (64, C)     = fc2_w.T ;  b2_ref : (1, C)
    # out_ref  : (Bb, C)
    block_b, cin, hw = x_ref.shape
    cout = wtap_ref.shape[1]

    x = x_ref[...]                          # (Bb, Cin, HW) f32
    w_taps = wtap_ref[...]                  # (9, Cout, Cin)
    masks = mask_ref[...]                   # (10, 1, HW)

    # ---- conv1 (3x3, pad=1): 9 accumulating matmuls over lane-rolled, masked views ----
    acc = jnp.zeros((block_b, cout, hw), jnp.float32)
    for kh in range(3):
        for kw in range(3):
            k = kh * 3 + kw
            delta = (kh - 1) * width + (kw - 1)          # lane offset of this tap
            xs = x if delta == 0 else pltpu.roll(x, (-delta) % hw, axis=2)
            xs = xs * masks[k]                           # zero out-of-image samples
            wt = jnp.broadcast_to(w_taps[k], (block_b, cout, cin))
            acc = acc + jnp.einsum("boc,bcn->bon", wt, xs,
                                   preferred_element_type=jnp.float32)

    # ---- 2x2 / stride-2 max-pool: max of 4 lane-rolled copies ----
    pooled = jnp.maximum(
        jnp.maximum(acc, pltpu.roll(acc, hw - 1, axis=2)),
        jnp.maximum(pltpu.roll(acc, hw - width, axis=2),
                    pltpu.roll(acc, hw - width - 1, axis=2)))
    # bias + ReLU AFTER the max (identical result, 4x less elementwise work)
    pooled = jnp.maximum(pooled + bconv_ref[...], 0.0)    # (Bb, Cout, HW)
    # only even-(h, w) lanes hold valid pool outputs; zero the rest (ReLU >= 0)
    pooled = pooled * masks[9]

    # ---- AdaptiveAvgPool2d((1,1)): per-batch full-lane reduce ----
    feats = jnp.sum(pooled, axis=2) * (4.0 / hw)          # (Bb, Cout)

    # ---- fc1 + ReLU, fc2 (batch-major; weights pre-transposed in the wrapper) ----
    h1 = jnp.maximum(
        jnp.dot(feats, w1_ref[...], preferred_element_type=jnp.float32)
        + b1_ref[...], 0.0)                               # (Bb, 64)
    out_ref[...] = (jnp.dot(h1, w2_ref[...], preferred_element_type=jnp.float32)
                    + b2_ref[...]).astype(out_ref.dtype)  # (Bb, C)


# ------------------------------- JAX glue ------------------------------------
def _conv_masks(H, W):
    """9 tap-validity masks (conv padding=1) + 1 even-(h,w) pool mask, (10,1,H*W) f32."""
    n = np.arange(H * W)
    hh, ww = n // W, n % W
    masks = []
    for kh in range(3):
        for kw in range(3):
            dh, dw = kh - 1, kw - 1
            masks.append((hh + dh >= 0) & (hh + dh < H) & (ww + dw >= 0) & (ww + dw < W))
    masks.append((hh % 2 == 0) & (ww % 2 == 0))
    return np.stack(masks)[:, None, :].astype(np.float32)


@jax.jit
def simplest_cnn_forward(x, conv_w, conv_b, fc1_w, fc1_b, fc2_w, fc2_b):
    B, Cin, H, W = x.shape
    assert H % 2 == 0 and W % 2 == 0, "even spatial dims (MaxPool2d(2,2) floor semantics)"
    Cout = conv_w.shape[0]
    hidden = fc1_w.shape[0]
    classes = fc2_w.shape[0]
    HW = H * W

    # Batch block: when gridding, block_b is a multiple of 8 so the (block_b, classes)
    # output block satisfies the (8,128) tiling rule; otherwise the whole batch.
    target_b = max(1, _LANE_TARGET // HW)
    block_b = B if B <= target_b else max(8, (target_b // 8) * 8)
    B_pad = pl.cdiv(B, block_b) * block_b

    x3 = x.reshape(B, Cin, HW)                      # zero-copy: no im2col, no transpose
    if B_pad != B:
        x3 = jnp.pad(x3, ((0, B_pad - B), (0, 0), (0, 0)))

    w_taps = jnp.transpose(conv_w, (2, 3, 0, 1)).reshape(9, Cout, Cin)
    b_conv = conv_b.reshape(1, Cout, 1)
    masks = jnp.asarray(_conv_masks(H, W))          # (10, 1, HW) compile-time constant
    w1_t = fc1_w.T                                  # (Cout, hidden)
    b1_r = fc1_b.reshape(1, hidden)
    w2_t = fc2_w.T                                  # (hidden, classes)
    b2_r = fc2_b.reshape(1, classes)

    full2 = lambda i: (0, 0)
    full3 = lambda i: (0, 0, 0)
    out = pl.pallas_call(
        functools.partial(simplest_cnn_kernel, width=W),
        out_shape=jax.ShapeDtypeStruct((B_pad, classes), jnp.float32),
        grid=(B_pad // block_b,),
        in_specs=[
            pl.BlockSpec((block_b, Cin, HW), lambda i: (i, 0, 0)),   # streamed input
            pl.BlockSpec((9, Cout, Cin), full3),                     # conv taps
            pl.BlockSpec((1, Cout, 1), full3),                       # conv bias
            pl.BlockSpec((10, 1, HW), full3),                        # border / pool masks
            pl.BlockSpec((Cout, hidden), full2),                     # fc1 weight (T)
            pl.BlockSpec((1, hidden), full2),                        # fc1 bias
            pl.BlockSpec((hidden, classes), full2),                  # fc2 weight (T)
            pl.BlockSpec((1, classes), full2),                       # fc2 bias
        ],
        out_specs=pl.BlockSpec((block_b, classes), lambda i: (i, 0)),
        compiler_params=pltpu.CompilerParams(
            dimension_semantics=("parallel",),       # shards batch grid over v7x's 2 TCs
            vmem_limit_bytes=32 * 1024 * 1024),
    )(x3, w_taps, b_conv, masks, w1_t, b1_r, w2_t, b2_r)
    return out[:B]                                   # drop batch padding, (B, classes)


# ------------------------- Pure-JAX reference --------------------------------
def reference_forward(x, conv_w, conv_b, fc1_w, fc1_b, fc2_w, fc2_b):
    y = jax.lax.conv_general_dilated(
        x, conv_w, window_strides=(1, 1), padding=((1, 1), (1, 1)),
        dimension_numbers=("NCHW", "OIHW", "NCHW"))
    y = y + conv_b.reshape(1, -1, 1, 1)
    y = jnp.maximum(y, 0.0)
    y = jax.lax.reduce_window(y, -jnp.inf, jax.lax.max,
                              (1, 1, 2, 2), (1, 1, 2, 2), "VALID")
    y = jnp.mean(y, axis=(2, 3))                     # adaptive avg pool (1,1) + flatten
    y = jnp.maximum(y @ fc1_w.T + fc1_b, 0.0)
    y = y @ fc2_w.T + fc2_b
    return y


# --------------------------------- main ---------------------------------------
if __name__ == "__main__":
    B, Cin, H, W = 2, 3, 16, 16
    classes = 10

    key = jax.random.PRNGKey(0)
    k = jax.random.split(key, 7)
    conv_w = 0.1 * jax.random.normal(k[0], (8, Cin, 3, 3), dtype=jnp.float32)
    conv_b = 0.1 * jax.random.normal(k[1], (8,), dtype=jnp.float32)
    fc1_w = 0.1 * jax.random.normal(k[2], (64, 8), dtype=jnp.float32)
    fc1_b = 0.1 * jax.random.normal(k[3], (64,), dtype=jnp.float32)
    fc2_w = 0.1 * jax.random.normal(k[4], (classes, 64), dtype=jnp.float32)
    fc2_b = 0.1 * jax.random.normal(k[5], (classes,), dtype=jnp.float32)
    x = jax.random.normal(k[6], (B, Cin, H, W), dtype=jnp.float32)

    out = simplest_cnn_forward(x, conv_w, conv_b, fc1_w, fc1_b, fc2_w, fc2_b)
    out = jax.block_until_ready(out)

    ref = reference_forward(x, conv_w, conv_b, fc1_w, fc1_b, fc2_w, fc2_b)
    ref = jax.block_until_ready(ref)

    np.testing.assert_allclose(np.asarray(out), np.asarray(ref), rtol=1e-4, atol=1e-4)
    assert out.shape == (B, classes)
    print("KERNEL_OK")
</pallas_src>

<mosaic_0001>
module attributes {stable_mosaic.version = 11 : i64} {
  func.func @simplest_cnn_kernel(%arg0: i32, %arg1: memref<2x3x256xf32, #tpu.memory_space<vmem>>, %arg2: memref<9x8x3xf32, #tpu.memory_space<vmem>>, %arg3: memref<1x8x1xf32, #tpu.memory_space<vmem>>, %arg4: memref<10x1x256xf32, #tpu.memory_space<vmem>>, %arg5: memref<8x64xf32, #tpu.memory_space<vmem>>, %arg6: memref<1x64xf32, #tpu.memory_space<vmem>>, %arg7: memref<64x10xf32, #tpu.memory_space<vmem>>, %arg8: memref<1x10xf32, #tpu.memory_space<vmem>>, %arg9: memref<2x10xf32, #tpu.memory_space<vmem>>) attributes {dimension_semantics = [#tpu.dimension_semantics<parallel>], iteration_bounds = array<i64: 1>, scalar_prefetch = 0 : i64, scratch_operands = 0 : i64, tpu.core_type = #tpu.core_type<tc>, window_params = [{transform_indices = @transform_0, window_bounds = array<i64: 2, 3, 256>}, {pipeline_mode = #tpu.pipeline_mode<synchronous>, transform_indices = @transform_1, window_bounds = array<i64: 9, 8, 3>}, {pipeline_mode = #tpu.pipeline_mode<synchronous>, transform_indices = @transform_2, window_bounds = array<i64: 1, 8, 1>}, {pipeline_mode = #tpu.pipeline_mode<synchronous>, transform_indices = @transform_3, window_bounds = array<i64: 10, 1, 256>}, {pipeline_mode = #tpu.pipeline_mode<synchronous>, transform_indices = @transform_4, window_bounds = array<i64: 8, 64>}, {pipeline_mode = #tpu.pipeline_mode<synchronous>, transform_indices = @transform_5, window_bounds = array<i64: 1, 64>}, {pipeline_mode = #tpu.pipeline_mode<synchronous>, transform_indices = @transform_6, window_bounds = array<i64: 64, 10>}, {pipeline_mode = #tpu.pipeline_mode<synchronous>, transform_indices = @transform_7, window_bounds = array<i64: 1, 10>}, {transform_indices = @transform_8, window_bounds = array<i64: 2, 10>}]} {
    %c0 = arith.constant 0 : index
    %c0_0 = arith.constant 0 : index
    %c0_1 = arith.constant 0 : index
    %0 = vector.load %arg1[%c0, %c0_0, %c0_1] : memref<2x3x256xf32, #tpu.memory_space<vmem>>, vector<2x3x256xf32>
    %c0_2 = arith.constant 0 : index
    %c0_3 = arith.constant 0 : index
    %c0_4 = arith.constant 0 : index
    %1 = vector.load %arg2[%c0_2, %c0_3, %c0_4] : memref<9x8x3xf32, #tpu.memory_space<vmem>>, vector<9x8x3xf32>
    %c0_5 = arith.constant 0 : index
    %c0_6 = arith.constant 0 : index
    %c0_7 = arith.constant 0 : index
    %2 = vector.load %arg4[%c0_5, %c0_6, %c0_7] : memref<10x1x256xf32, #tpu.memory_space<vmem>>, vector<10x1x256xf32>
    %cst = arith.constant 0.000000e+00 : f32
    %3 = vector.broadcast %cst : f32 to vector<2x8x256xf32>
    %c17_i32 = arith.constant 17 : i32
    %4 = tpu.dynamic_rotate %0 by %c17_i32 dim 2 : vector<2x3x256xf32>, i32 -> vector<2x3x256xf32>
    %5 = vector.extract_strided_slice %2 {offsets = [0, 0, 0], sizes = [1, 1, 256], strides = [1, 1, 1]} : vector<10x1x256xf32> to vector<1x1x256xf32>
    %6 = vector.shape_cast %5 : vector<1x1x256xf32> to vector<1x256xf32>
    %7 = vector.shape_cast %6 : vector<1x256xf32> to vector<1x1x256xf32>
    %8 = vector.broadcast %7 : vector<1x1x256xf32> to vector<2x3x256xf32>
    %9 = arith.mulf %4, %8 : vector<2x3x256xf32>
    %10 = vector.extract_strided_slice %1 {offsets = [0, 0, 0], sizes = [1, 8, 3], strides = [1, 1, 1]} : vector<9x8x3xf32> to vector<1x8x3xf32>
    %11 = vector.shape_cast %10 : vector<1x8x3xf32> to vector<8x3xf32>
    %12 = vector.shape_cast %11 : vector<8x3xf32> to vector<1x8x3xf32>
    %13 = vector.broadcast %12 : vector<1x8x3xf32> to vector<2x8x3xf32>
    "tpu.trace_start"() <{level = 10 : i32, message = "boc,bcn->bon"}> : () -> ()
    %cst_8 = arith.constant dense<0.000000e+00> : vector<2x8x256xf32>
    %14 = tpu.matmul %13, %9, %cst_8 {dimension_numbers = #tpu.dot_dimension_numbers<[2], [1], [1], [2], [0, 0, 0, 1, 1, 2], [0], [0]>} : vector<2x8x3xf32>, vector<2x3x256xf32>, vector<2x8x256xf32> -> vector<2x8x256xf32>
    "tpu.trace_stop"() : () -> ()
    %15 = arith.addf %3, %14 : vector<2x8x256xf32>
    %c16_i32 = arith.constant 16 : i32
    %16 = tpu.dynamic_rotate %0 by %c16_i32 dim 2 : vector<2x3x256xf32>, i32 -> vector<2x3x256xf32>
    %17 = vector.extract_strided_slice %2 {offsets = [1, 0, 0], sizes = [1, 1, 256], strides = [1, 1, 1]} : vector<10x1x256xf32> to vector<1x1x256xf32>
    %18 = vector.shape_cast %17 : vector<1x1x256xf32> to vector<1x256xf32>
    %19 = vector.shape_cast %18 : vector<1x256xf32> to vector<1x1x256xf32>
    %20 = vector.broadcast %19 : vector<1x1x256xf32> to vector<2x3x256xf32>
    %21 = arith.mulf %16, %20 : vector<2x3x256xf32>
    %22 = vector.extract_strided_slice %1 {offsets = [1, 0, 0], sizes = [1, 8, 3], strides = [1, 1, 1]} : vector<9x8x3xf32> to vector<1x8x3xf32>
    %23 = vector.shape_cast %22 : vector<1x8x3xf32> to vector<8x3xf32>
    %24 = vector.shape_cast %23 : vector<8x3xf32> to vector<1x8x3xf32>
    %25 = vector.broadcast %24 : vector<1x8x3xf32> to vector<2x8x3xf32>
    "tpu.trace_start"() <{level = 10 : i32, message = "boc,bcn->bon"}> : () -> ()
    %cst_9 = arith.constant dense<0.000000e+00> : vector<2x8x256xf32>
    %26 = tpu.matmul %25, %21, %cst_9 {dimension_numbers = #tpu.dot_dimension_numbers<[2], [1], [1], [2], [0, 0, 0, 1, 1, 2], [0], [0]>} : vector<2x8x3xf32>, vector<2x3x256xf32>, vector<2x8x256xf32> -> vector<2x8x256xf32>
    "tpu.trace_stop"() : () -> ()
    %27 = arith.addf %15, %26 : vector<2x8x256xf32>
    %c15_i32 = arith.constant 15 : i32
    %28 = tpu.dynamic_rotate %0 by %c15_i32 dim 2 : vector<2x3x256xf32>, i32 -> vector<2x3x256xf32>
    %29 = vector.extract_strided_slice %2 {offsets = [2, 0, 0], sizes = [1, 1, 256], strides = [1, 1, 1]} : vector<10x1x256xf32> to vector<1x1x256xf32>
    %30 = vector.shape_cast %29 : vector<1x1x256xf32> to vector<1x256xf32>
    %31 = vector.shape_cast %30 : vector<1x256xf32> to vector<1x1x256xf32>
    %32 = vector.broadcast %31 : vector<1x1x256xf32> to vector<2x3x256xf32>
    %33 = arith.mulf %28, %32 : vector<2x3x256xf32>
    %34 = vector.extract_strided_slice %1 {offsets = [2, 0, 0], sizes = [1, 8, 3], strides = [1, 1, 1]} : vector<9x8x3xf32> to vector<1x8x3xf32>
    %35 = vector.shape_cast %34 : vector<1x8x3xf32> to vector<8x3xf32>
    %36 = vector.shape_cast %35 : vector<8x3xf32> to vector<1x8x3xf32>
    %37 = vector.broadcast %36 : vector<1x8x3xf32> to vector<2x8x3xf32>
    "tpu.trace_start"() <{level = 10 : i32, message = "boc,bcn->bon"}> : () -> ()
    %cst_10 = arith.constant dense<0.000000e+00> : vector<2x8x256xf32>
    %38 = tpu.matmul %37, %33, %cst_10 {dimension_numbers = #tpu.dot_dimension_numbers<[2], [1], [1], [2], [0, 0, 0, 1, 1, 2], [0], [0]>} : vector<2x8x3xf32>, vector<2x3x256xf32>, vector<2x8x256xf32> -> vector<2x8x256xf32>
    "tpu.trace_stop"() : () -> ()
    %39 = arith.addf %27, %38 : vector<2x8x256xf32>
    %c1_i32 = arith.constant 1 : i32
    %40 = tpu.dynamic_rotate %0 by %c1_i32 dim 2 : vector<2x3x256xf32>, i32 -> vector<2x3x256xf32>
    %41 = vector.extract_strided_slice %2 {offsets = [3, 0, 0], sizes = [1, 1, 256], strides = [1, 1, 1]} : vector<10x1x256xf32> to vector<1x1x256xf32>
    %42 = vector.shape_cast %41 : vector<1x1x256xf32> to vector<1x256xf32>
    %43 = vector.shape_cast %42 : vector<1x256xf32> to vector<1x1x256xf32>
    %44 = vector.broadcast %43 : vector<1x1x256xf32> to vector<2x3x256xf32>
    %45 = arith.mulf %40, %44 : vector<2x3x256xf32>
    %46 = vector.extract_strided_slice %1 {offsets = [3, 0, 0], sizes = [1, 8, 3], strides = [1, 1, 1]} : vector<9x8x3xf32> to vector<1x8x3xf32>
    %47 = vector.shape_cast %46 : vector<1x8x3xf32> to vector<8x3xf32>
    %48 = vector.shape_cast %47 : vector<8x3xf32> to vector<1x8x3xf32>
    %49 = vector.broadcast %48 : vector<1x8x3xf32> to vector<2x8x3xf32>
    "tpu.trace_start"() <{level = 10 : i32, message = "boc,bcn->bon"}> : () -> ()
    %cst_11 = arith.constant dense<0.000000e+00> : vector<2x8x256xf32>
    %50 = tpu.matmul %49, %45, %cst_11 {dimension_numbers = #tpu.dot_dimension_numbers<[2], [1], [1], [2], [0, 0, 0, 1, 1, 2], [0], [0]>} : vector<2x8x3xf32>, vector<2x3x256xf32>, vector<2x8x256xf32> -> vector<2x8x256xf32>
    "tpu.trace_stop"() : () -> ()
    %51 = arith.addf %39, %50 : vector<2x8x256xf32>
    %52 = vector.extract_strided_slice %2 {offsets = [4, 0, 0], sizes = [1, 1, 256], strides = [1, 1, 1]} : vector<10x1x256xf32> to vector<1x1x256xf32>
    %53 = vector.shape_cast %52 : vector<1x1x256xf32> to vector<1x256xf32>
    %54 = vector.shape_cast %53 : vector<1x256xf32> to vector<1x1x256xf32>
    %55 = vector.broadcast %54 : vector<1x1x256xf32> to vector<2x3x256xf32>
    %56 = arith.mulf %0, %55 : vector<2x3x256xf32>
    %57 = vector.extract_strided_slice %1 {offsets = [4, 0, 0], sizes = [1, 8, 3], strides = [1, 1, 1]} : vector<9x8x3xf32> to vector<1x8x3xf32>
    %58 = vector.shape_cast %57 : vector<1x8x3xf32> to vector<8x3xf32>
    %59 = vector.shape_cast %58 : vector<8x3xf32> to vector<1x8x3xf32>
    %60 = vector.broadcast %59 : vector<1x8x3xf32> to vector<2x8x3xf32>
    "tpu.trace_start"() <{level = 10 : i32, message = "boc,bcn->bon"}> : () -> ()
    %cst_12 = arith.constant dense<0.000000e+00> : vector<2x8x256xf32>
    %61 = tpu.matmul %60, %56, %cst_12 {dimension_numbers = #tpu.dot_dimension_numbers<[2], [1], [1], [2], [0, 0, 0, 1, 1, 2], [0], [0]>} : vector<2x8x3xf32>, vector<2x3x256xf32>, vector<2x8x256xf32> -> vector<2x8x256xf32>
    "tpu.trace_stop"() : () -> ()
    %62 = arith.addf %51, %61 : vector<2x8x256xf32>
    %c255_i32 = arith.constant 255 : i32
    %63 = tpu.dynamic_rotate %0 by %c255_i32 dim 2 : vector<2x3x256xf32>, i32 -> vector<2x3x256xf32>
    %64 = vector.extract_strided_slice %2 {offsets = [5, 0, 0], sizes = [1, 1, 256], strides = [1, 1, 1]} : vector<10x1x256xf32> to vector<1x1x256xf32>
    %65 = vector.shape_cast %64 : vector<1x1x256xf32> to vector<1x256xf32>
    %66 = vector.shape_cast %65 : vector<1x256xf32> to vector<1x1x256xf32>
    %67 = vector.broadcast %66 : vector<1x1x256xf32> to vector<2x3x256xf32>
    %68 = arith.mulf %63, %67 : vector<2x3x256xf32>
    %69 = vector.extract_strided_slice %1 {offsets = [5, 0, 0], sizes = [1, 8, 3], strides = [1, 1, 1]} : vector<9x8x3xf32> to vector<1x8x3xf32>
    %70 = vector.shape_cast %69 : vector<1x8x3xf32> to vector<8x3xf32>
    %71 = vector.shape_cast %70 : vector<8x3xf32> to vector<1x8x3xf32>
    %72 = vector.broadcast %71 : vector<1x8x3xf32> to vector<2x8x3xf32>
    "tpu.trace_start"() <{level = 10 : i32, message = "boc,bcn->bon"}> : () -> ()
    %cst_13 = arith.constant dense<0.000000e+00> : vector<2x8x256xf32>
    %73 = tpu.matmul %72, %68, %cst_13 {dimension_numbers = #tpu.dot_dimension_numbers<[2], [1], [1], [2], [0, 0, 0, 1, 1, 2], [0], [0]>} : vector<2x8x3xf32>, vector<2x3x256xf32>, vector<2x8x256xf32> -> vector<2x8x256xf32>
    "tpu.trace_stop"() : () -> ()
    %74 = arith.addf %62, %73 : vector<2x8x256xf32>
    %c241_i32 = arith.constant 241 : i32
    %75 = tpu.dynamic_rotate %0 by %c241_i32 dim 2 : vector<2x3x256xf32>, i32 -> vector<2x3x256xf32>
    %76 = vector.extract_strided_slice %2 {offsets = [6, 0, 0], sizes = [1, 1, 256], strides = [1, 1, 1]} : vector<10x1x256xf32> to vector<1x1x256xf32>
    %77 = vector.shape_cast %76 : vector<1x1x256xf32> to vector<1x256xf32>
    %78 = vector.shape_cast %77 : vector<1x256xf32> to vector<1x1x256xf32>
    %79 = vector.broadcast %78 : vector<1x1x256xf32> to vector<2x3x256xf32>
    %80 = arith.mulf %75, %79 : vector<2x3x256xf32>
    %81 = vector.extract_strided_slice %1 {offsets = [6, 0, 0], sizes = [1, 8, 3], strides = [1, 1, 1]} : vector<9x8x3xf32> to vector<1x8x3xf32>
    %82 = vector.shape_cast %81 : vector<1x8x3xf32> to vector<8x3xf32>
    %83 = vector.shape_cast %82 : vector<8x3xf32> to vector<1x8x3xf32>
    %84 = vector.broadcast %83 : vector<1x8x3xf32> to vector<2x8x3xf32>
    "tpu.trace_start"() <{level = 10 : i32, message = "boc,bcn->bon"}> : () -> ()
    %cst_14 = arith.constant dense<0.000000e+00> : vector<2x8x256xf32>
    %85 = tpu.matmul %84, %80, %cst_14 {dimension_numbers = #tpu.dot_dimension_numbers<[2], [1], [1], [2], [0, 0, 0, 1, 1, 2], [0], [0]>} : vector<2x8x3xf32>, vector<2x3x256xf32>, vector<2x8x256xf32> -> vector<2x8x256xf32>
    "tpu.trace_stop"() : () -> ()
    %86 = arith.addf %74, %85 : vector<2x8x256xf32>
    %c240_i32 = arith.constant 240 : i32
    %87 = tpu.dynamic_rotate %0 by %c240_i32 dim 2 : vector<2x3x256xf32>, i32 -> vector<2x3x256xf32>
    %88 = vector.extract_strided_slice %2 {offsets = [7, 0, 0], sizes = [1, 1, 256], strides = [1, 1, 1]} : vector<10x1x256xf32> to vector<1x1x256xf32>
    %89 = vector.shape_cast %88 : vector<1x1x256xf32> to vector<1x256xf32>
    %90 = vector.shape_cast %89 : vector<1x256xf32> to vector<1x1x256xf32>
    %91 = vector.broadcast %90 : vector<1x1x256xf32> to vector<2x3x256xf32>
    %92 = arith.mulf %87, %91 : vector<2x3x256xf32>
    %93 = vector.extract_strided_slice %1 {offsets = [7, 0, 0], sizes = [1, 8, 3], strides = [1, 1, 1]} : vector<9x8x3xf32> to vector<1x8x3xf32>
    %94 = vector.shape_cast %93 : vector<1x8x3xf32> to vector<8x3xf32>
    %95 = vector.shape_cast %94 : vector<8x3xf32> to vector<1x8x3xf32>
    %96 = vector.broadcast %95 : vector<1x8x3xf32> to vector<2x8x3xf32>
    "tpu.trace_start"() <{level = 10 : i32, message = "boc,bcn->bon"}> : () -> ()
    %cst_15 = arith.constant dense<0.000000e+00> : vector<2x8x256xf32>
    %97 = tpu.matmul %96, %92, %cst_15 {dimension_numbers = #tpu.dot_dimension_numbers<[2], [1], [1], [2], [0, 0, 0, 1, 1, 2], [0], [0]>} : vector<2x8x3xf32>, vector<2x3x256xf32>, vector<2x8x256xf32> -> vector<2x8x256xf32>
    "tpu.trace_stop"() : () -> ()
    %98 = arith.addf %86, %97 : vector<2x8x256xf32>
    %c239_i32 = arith.constant 239 : i32
    %99 = tpu.dynamic_rotate %0 by %c239_i32 dim 2 : vector<2x3x256xf32>, i32 -> vector<2x3x256xf32>
    %100 = vector.extract_strided_slice %2 {offsets = [8, 0, 0], sizes = [1, 1, 256], strides = [1, 1, 1]} : vector<10x1x256xf32> to vector<1x1x256xf32>
    %101 = vector.shape_cast %100 : vector<1x1x256xf32> to vector<1x256xf32>
    %102 = vector.shape_cast %101 : vector<1x256xf32> to vector<1x1x256xf32>
    %103 = vector.broadcast %102 : vector<1x1x256xf32> to vector<2x3x256xf32>
    %104 = arith.mulf %99, %103 : vector<2x3x256xf32>
    %105 = vector.extract_strided_slice %1 {offsets = [8, 0, 0], sizes = [1, 8, 3], strides = [1, 1, 1]} : vector<9x8x3xf32> to vector<1x8x3xf32>
    %106 = vector.shape_cast %105 : vector<1x8x3xf32> to vector<8x3xf32>
    %107 = vector.shape_cast %106 : vector<8x3xf32> to vector<1x8x3xf32>
    %108 = vector.broadcast %107 : vector<1x8x3xf32> to vector<2x8x3xf32>
    "tpu.trace_start"() <{level = 10 : i32, message = "boc,bcn->bon"}> : () -> ()
    %cst_16 = arith.constant dense<0.000000e+00> : vector<2x8x256xf32>
    %109 = tpu.matmul %108, %104, %cst_16 {dimension_numbers = #tpu.dot_dimension_numbers<[2], [1], [1], [2], [0, 0, 0, 1, 1, 2], [0], [0]>} : vector<2x8x3xf32>, vector<2x3x256xf32>, vector<2x8x256xf32> -> vector<2x8x256xf32>
    "tpu.trace_stop"() : () -> ()
    %110 = arith.addf %98, %109 : vector<2x8x256xf32>
    %c255_i32_17 = arith.constant 255 : i32
    %111 = tpu.dynamic_rotate %110 by %c255_i32_17 dim 2 : vector<2x8x256xf32>, i32 -> vector<2x8x256xf32>
    %112 = arith.maximumf %110, %111 : vector<2x8x256xf32>
    %c240_i32_18 = arith.constant 240 : i32
    %113 = tpu.dynamic_rotate %110 by %c240_i32_18 dim 2 : vector<2x8x256xf32>, i32 -> vector<2x8x256xf32>
    %c239_i32_19 = arith.constant 239 : i32
    %114 = tpu.dynamic_rotate %110 by %c239_i32_19 dim 2 : vector<2x8x256xf32>, i32 -> vector<2x8x256xf32>
    %115 = arith.maximumf %113, %114 : vector<2x8x256xf32>
    %116 = arith.maximumf %112, %115 : vector<2x8x256xf32>
    %c0_20 = arith.constant 0 : index
    %c0_21 = arith.constant 0 : index
    %c0_22 = arith.constant 0 : index
    %117 = vector.load %arg3[%c0_20, %c0_21, %c0_22] : memref<1x8x1xf32, #tpu.memory_space<vmem>>, vector<1x8x1xf32>
    %118 = vector.broadcast %117 : vector<1x8x1xf32> to vector<2x8x256xf32>
    %119 = arith.addf %116, %118 : vector<2x8x256xf32>
    %cst_23 = arith.constant 0.000000e+00 : f32
    %120 = vector.broadcast %cst_23 : f32 to vector<2x8x256xf32>
    %121 = arith.maximumf %119, %120 : vector<2x8x256xf32>
    %122 = vector.extract_strided_slice %2 {offsets = [9, 0, 0], sizes = [1, 1, 256], strides = [1, 1, 1]} : vector<10x1x256xf32> to vector<1x1x256xf32>
    %123 = vector.shape_cast %122 : vector<1x1x256xf32> to vector<1x256xf32>
    %124 = vector.shape_cast %123 : vector<1x256xf32> to vector<1x1x256xf32>
    %125 = vector.broadcast %124 : vector<1x1x256xf32> to vector<2x8x256xf32>
    %126 = arith.mulf %121, %125 : vector<2x8x256xf32>
    %cst_24 = arith.constant dense<0.000000e+00> : vector<2x8xf32>
    %127 = vector.multi_reduction <add>, %126, %cst_24 [2] : vector<2x8x256xf32> to vector<2x8xf32>
    %cst_25 = arith.constant 1.562500e-02 : f32
    %128 = vector.broadcast %cst_25 : f32 to vector<2x8xf32>
    %129 = arith.mulf %127, %128 : vector<2x8xf32>
    %c0_26 = arith.constant 0 : index
    %c0_27 = arith.constant 0 : index
    %130 = vector.load %arg5[%c0_26, %c0_27] : memref<8x64xf32, #tpu.memory_space<vmem>>, vector<8x64xf32>
    %cst_28 = arith.constant dense<0.000000e+00> : vector<2x64xf32>
    %131 = tpu.matmul %129, %130, %cst_28 {dimension_numbers = #tpu.dot_dimension_numbers<[1], [0], [0], [1], [0, 0, 1, 1], [], []>} : vector<2x8xf32>, vector<8x64xf32>, vector<2x64xf32> -> vector<2x64xf32>
    %c0_29 = arith.constant 0 : index
    %c0_30 = arith.constant 0 : index
    %132 = vector.load %arg6[%c0_29, %c0_30] : memref<1x64xf32, #tpu.memory_space<vmem>>, vector<1x64xf32>
    %133 = vector.broadcast %132 : vector<1x64xf32> to vector<2x64xf32>
    %134 = arith.addf %131, %133 : vector<2x64xf32>
    %cst_31 = arith.constant 0.000000e+00 : f32
    %135 = vector.broadcast %cst_31 : f32 to vector<2x64xf32>
    %136 = arith.maximumf %134, %135 : vector<2x64xf32>
    %c0_32 = arith.constant 0 : index
    %c0_33 = arith.constant 0 : index
    %137 = vector.load %arg7[%c0_32, %c0_33] : memref<64x10xf32, #tpu.memory_space<vmem>>, vector<64x10xf32>
    %cst_34 = arith.constant dense<0.000000e+00> : vector<2x10xf32>
    %138 = tpu.matmul %136, %137, %cst_34 {dimension_numbers = #tpu.dot_dimension_numbers<[1], [0], [0], [1], [0, 0, 1, 1], [], []>} : vector<2x64xf32>, vector<64x10xf32>, vector<2x10xf32> -> vector<2x10xf32>
    %c0_35 = arith.constant 0 : index
    %c0_36 = arith.constant 0 : index
    %139 = vector.load %arg8[%c0_35, %c0_36] : memref<1x10xf32, #tpu.memory_space<vmem>>, vector<1x10xf32>
    %140 = vector.broadcast %139 : vector<1x10xf32> to vector<2x10xf32>
    %141 = arith.addf %138, %140 : vector<2x10xf32>
    %c0_37 = arith.constant 0 : index
    %c0_38 = arith.constant 0 : index
    %142 = vector.load %arg9[%c0_37, %c0_38] : memref<2x10xf32, #tpu.memory_space<vmem>>, vector<2x10xf32>
    tpu.vector_store %arg9[%c0_37, %c0_38], %141 {strides = array<i32>} : memref<2x10xf32, #tpu.memory_space<vmem>>, vector<2x10xf32>,
    return
  }
  func.func @transform_0(%arg0: i32) -> (i32, i32, i32) {
    %c0_i32 = arith.constant 0 : i32
    %c0_i32_0 = arith.constant 0 : i32
    %c0_i32_1 = arith.constant 0 : i32
    return %arg0, %c0_i32, %c0_i32_0 : i32, i32, i32
  }
  func.func @transform_1(%arg0: i32) -> (i32, i32, i32) {
    %c0_i32 = arith.constant 0 : i32
    %c0_i32_0 = arith.constant 0 : i32
    %c0_i32_1 = arith.constant 0 : i32
    %c0_i32_2 = arith.constant 0 : i32
    return %c0_i32, %c0_i32_0, %c0_i32_1 : i32, i32, i32
  }
  func.func @transform_2(%arg0: i32) -> (i32, i32, i32) {
    %c0_i32 = arith.constant 0 : i32
    %c0_i32_0 = arith.constant 0 : i32
    %c0_i32_1 = arith.constant 0 : i32
    %c0_i32_2 = arith.constant 0 : i32
    return %c0_i32, %c0_i32_0, %c0_i32_1 : i32, i32, i32
  }
  func.func @transform_3(%arg0: i32) -> (i32, i32, i32) {
    %c0_i32 = arith.constant 0 : i32
    %c0_i32_0 = arith.constant 0 : i32
    %c0_i32_1 = arith.constant 0 : i32
    %c0_i32_2 = arith.constant 0 : i32
    return %c0_i32, %c0_i32_0, %c0_i32_1 : i32, i32, i32
  }
  func.func @transform_4(%arg0: i32) -> (i32, i32) {
    %c0_i32 = arith.constant 0 : i32
    %c0_i32_0 = arith.constant 0 : i32
    %c0_i32_1 = arith.constant 0 : i32
    return %c0_i32, %c0_i32_0 : i32, i32
  }
  func.func @transform_5(%arg0: i32) -> (i32, i32) {
    %c0_i32 = arith.constant 0 : i32
    %c0_i32_0 = arith.constant 0 : i32
    %c0_i32_1 = arith.constant 0 : i32
    return %c0_i32, %c0_i32_0 : i32, i32
  }
  func.func @transform_6(%arg0: i32) -> (i32, i32) {
    %c0_i32 = arith.constant 0 : i32
    %c0_i32_0 = arith.constant 0 : i32
    %c0_i32_1 = arith.constant 0 : i32
    return %c0_i32, %c0_i32_0 : i32, i32
  }
  func.func @transform_7(%arg0: i32) -> (i32, i32) {
    %c0_i32 = arith.constant 0 : i32
    %c0_i32_0 = arith.constant 0 : i32
    %c0_i32_1 = arith.constant 0 : i32
    return %c0_i32, %c0_i32_0 : i32, i32
  }
  func.func @transform_8(%arg0: i32) -> (i32, i32) {
    %c0_i32 = arith.constant 0 : i32
    %c0_i32_0 = arith.constant 0 : i32
    return %arg0, %c0_i32 : i32, i32
  }
}

</mosaic_0001>

<bundles_post_ra>
// kernel: simplest_cnn_forward.1
= control target key start
LH: loop header
LB: loop body
LE: loop exit
PB: predicated region body
PF: predicated region fallthrough
CT: control target
= control target key end

     0   :  { %s2200_s9 = smov 16   ;;  %v2201_v4 = vmov 0.0   ;;  %s2614_s0 = inlined_call_operand.vmem [shape: f32[2,3,256], index: 0, kind: input, shape index: {}]   ;;  %s2615_s1 = inlined_call_operand.vmem [shape: f32[9,8,3], index: 1, kind: input, shape index: {}]   ;;  %s2616_s2 = inlined_call_operand.vmem [shape: f32[1,8,1], index: 2, kind: input, shape index: {}]   ;;  %s2617_s3 = inlined_call_operand.vmem [shape: f32[10,1,256], index: 3, kind: input, shape index: {}]   ;;  %s2618_s4 = inlined_call_operand.vmem [shape: f32[8,64], index: 4, kind: input, shape index: {}]   ;;  %s2619_s5 = inlined_call_operand.vmem [shape: f32[1,64], index: 5, kind: input, shape index: {}]   ;;  %s2620_s6 = inlined_call_operand.vmem [shape: f32[64,10], index: 6, kind: input, shape index: {}]   ;;  %s2621_s7 = inlined_call_operand.vmem [shape: f32[1,10], index: 7, kind: input, shape index: {}]   ;;  %s2622_s8 = inlined_call_operand.hbm [shape: f32[2,10], index: 8, kind: output, shape index: {}]  }
   0x1   :  { %v2261_v0 = vld [vmem:[%s2614_s0 + $0x8] sm:$0x77]  ;;  %v2266_v1 = vld [vmem:[%s2614_s0] sm:$0x77]  ;;  %190 = vmatprep.mubr.f32.mxu0 %v2201_v4  ;;  %424 = vmatprep.mubr.f32.mxu1 %v2201_v4 }
   0x2   :  { %89 = vrot.lane.b32.xlu1 %v2261_v0, %s2200_s9  ;;  %87 = vrot.lane.b32.xlu0 %v2266_v1, %s2200_s9  ;;  %v54_v2 = vcombine.high %v2261_v0, %v2261_v0  ;;  %v53_v3 = vcombine.high %v2266_v1, %v2266_v1 }
   0x6   :  { %93 = vrot.lane.b32.xlu1 %v54_v2, %s2200_s9  ;;  %91 = vrot.lane.b32.xlu0 %v53_v3, %s2200_s9 }
   0x7   :  { %13 = vsyncpa [#allocation3], 0  ;;  %s2202_s0 = smov 17   ;;  %s2203_s10 = smov 15   ;;  %v65_v5 = vlaneseq  ;;  %v42_v10 = vld [vmem:[%s2617_s3 + $0x2] sm:$0x3] }
   0x8   :  { %s2204_s11 = smov 1   ;;  %s2205_s12 = smov 127   ;;  %v41_v15 = vld [vmem:[%s2617_s3] sm:$0x3]  ;;  %vm119_vm1 = vcmask 1042432   ;;  %v33_v26 = vld [vmem:[%s2615_s1 + $0x8] sm:$0xff] }
   0x9   :  { %s2206_s13 = smov 113   ;;  %s2207_s14 = smov 112   ;;  %v2302_v6 = vshrl.u32 %v65_v5, 7  ;;  %v2304_v7 = vand.u32 127, %v65_v5  ;;  %vm115_vm3 = vcmask 23552   ;;  %v32_v37 = vld [vmem:[%s2615_s1] sm:$0xff] }
   0xa   :  { %63 = vrot.lane.b32.xlu1 %v54_v2, %s2202_s0  ;;  %59 = vrot.lane.b32.xlu0 %v2261_v0, %s2202_s0  ;;  %s2208_s15 = smov 111   ;;  %v43_v33 = vld [vmem:[%s2617_s3 + $0x4] sm:$0x3]  ;;  %v45_v36 = vld [vmem:[%s2617_s3 + $0x8] sm:$0x3]  ;;  %vm2210_vm10 = vmmov 0  }
   0xb   :  { %v2307_v8 = vsub.s32 0, %v2302_v6  ;;  %v2310_v9 = vsub.s32 1, %v2302_v6  ;;  %vm95_vm0 = vcmp.lt.s32.totalorder %v2304_v7, 16  ;;  %vm67_vm2 = vcmp.lt.s32.totalorder %v2304_v7, 17  ;;  %v44_v54 = vld [vmem:[%s2617_s3 + $0x6] sm:$0x3] }
   0xc   :  { %vm439_vm4 = vcmp.lt.s32.totalorder %v2304_v7, 15  ;;  %v34_v56 = vld [vmem:[%s2615_s1 + $0x10] sm:$0xff]  ;;  %vm628_vm5 = vcmp.lt.s32.totalorder %v2304_v7, 1  ;;  %vm991_vm6 = vcmp.lt.s32.totalorder %v2304_v7, 127  ;;  %vm1180_vm7 = vcmp.lt.s32.totalorder %v2304_v7, 113  ;;  %s2212_s9 = smov [#allocation2]  }
   0xd   :  { %v104_v13 = vrot.slane %v42_v10, %v2307_v8  ;;  %v108_v14 = vrot.slane %v42_v10, %v2310_v9  ;;  %v76_v21 = vrot.slane %v41_v15, %v2307_v8  ;;  %v80_v25 = vrot.slane %v41_v15, %v2310_v9 }
   0xe   :  { %61 = vrot.lane.b32.xlu1 %v53_v3, %s2202_s0  ;;  %57 = vrot.lane.b32.xlu0 %v2266_v1, %s2202_s0  ;;  %v448_v40 = vrot.slane %v43_v33, %v2307_v8  ;;  %v452_v43 = vrot.slane %v43_v33, %v2310_v9  ;;  %v813_v44 = vrot.slane %v45_v36, %v2307_v8  ;;  %v47_v33 = vld [vmem:[%s2617_s3 + $0xc] sm:$0x3]  ;;  %vm1369_vm8 = vcmp.lt.s32.totalorder %v2304_v7, 112  ;;  %s2015_s0 = sshll.u32 %s2212_s9, 4  ;;  %s2016_s0 = int_to_ptr.vmem [resolvable:$true] %s2015_s0 }
   0xf   :  { %v817_v47 = vrot.slane %v45_v36, %v2310_v9  ;;  %v637_v61 = vrot.slane %v44_v54, %v2307_v8  ;;  %vm1558_vm9 = vcmp.lt.s32.totalorder %v2304_v7, 111  ;;  %vm1842_vm11 = vcmask 1041409   ;;  %p2181_p1 = scmp.lt.s32.totalorder %s2016_s0, %s2016_s0 }
  0x10   :  { %vm1844_vm12 = vcmask 64512   ;;  %vm1933_vm13 = vcmask 523264   ;;  %vm2007_vm14 = vcmask 74752  }
  0x11   :  { %v818_v55 = vcombine.low %v813_v44, %v817_v47  ;;  %v37_v47 = vld [vmem:[%s2615_s1 + $0x28] sm:$0xff] }
  0x12   :  { %437 = vrot.lane.b32.xlu1 %v54_v2, %s2203_s10  ;;  %433 = vrot.lane.b32.xlu0 %v2261_v0, %s2203_s10 }
  0x16   :  { %435 = vrot.lane.b32.xlu1 %v53_v3, %s2203_s10  ;;  %431 = vrot.lane.b32.xlu0 %v2266_v1, %s2203_s10 }
  0x1a   :  { %626 = vrot.lane.b32.xlu1 %v54_v2, %s2204_s11  ;;  %622 = vrot.lane.b32.xlu0 %v2261_v0, %s2204_s11 }
  0x1e   :  { %624 = vrot.lane.b32.xlu1 %v53_v3, %s2204_s11  ;;  %620 = vrot.lane.b32.xlu0 %v2266_v1, %s2204_s11 }
  0x22   :  { %989 = vrot.lane.b32.xlu1 %v54_v2, %s2205_s12  ;;  %985 = vrot.lane.b32.xlu0 %v2261_v0, %s2205_s12 }
  0x26   :  { %987 = vrot.lane.b32.xlu1 %v53_v3, %s2205_s12  ;;  %983 = vrot.lane.b32.xlu0 %v2266_v1, %s2205_s12 }
  0x2a   :  { %1178 = vrot.lane.b32.xlu1 %v54_v2, %s2206_s13  ;;  %1174 = vrot.lane.b32.xlu0 %v2261_v0, %s2206_s13 }
  0x2e   :  { %1176 = vrot.lane.b32.xlu1 %v53_v3, %s2206_s13  ;;  %1172 = vrot.lane.b32.xlu0 %v2266_v1, %s2206_s13 }
  0x32   :  { %1367 = vrot.lane.b32.xlu1 %v54_v2, %s2207_s14  ;;  %1363 = vrot.lane.b32.xlu0 %v2261_v0, %s2207_s14 }
  0x36   :  { %1365 = vrot.lane.b32.xlu1 %v53_v3, %s2207_s14  ;;  %1361 = vrot.lane.b32.xlu0 %v2266_v1, %s2207_s14 }
  0x3a   :  { %1556 = vrot.lane.b32.xlu1 %v54_v2, %s2208_s15  ;;  %1552 = vrot.lane.b32.xlu0 %v2261_v0, %s2208_s15  ;;  %v641_v2 = vrot.slane %v44_v54, %v2310_v9 }
  0x3e   :  { %1554 = vrot.lane.b32.xlu1 %v53_v3, %s2208_s15  ;;  %1550 = vrot.lane.b32.xlu0 %v2266_v1, %s2208_s15  ;;  %v821_v3 = vmul.f32 %v818_v55, %v2261_v0 }
  0x40   :  { %v903_v0 = vcombine.high %v821_v3, %v821_v3 }
  0x74   :  { %v90_v11 = vpop.permute.xlu1 %89  ;;  %v88_v12 = vpop.permute.xlu0 %87 }
  0x78   :  { %v94_v16 = vpop.permute.xlu1 %93  ;;  %v92_v17 = vpop.permute.xlu0 %91 }
  0x79   :  { %v97_v18 = vsel %vm95_vm0, %v90_v11, %v94_v16  ;;  %v96_v19 = vsel %vm95_vm0, %v88_v12, %v92_v17  ;;  %v98_v20 = vsel %vm95_vm0, %v92_v17, %v88_v12  ;;  %v99_v22 = vsel %vm95_vm0, %v94_v16, %v90_v11  ;;  %v35_v16 = vld [vmem:[%s2615_s1 + $0x18] sm:$0xff]  ;;  %v46_v17 = vld [vmem:[%s2617_s3 + $0xa] sm:$0x3] }
  0x7a   :  { %v111_v23 = vmul.f32 %v104_v13, %v98_v20  ;;  %v112_v24 = vmul.f32 %v108_v14, %v96_v19  ;;  %v114_v27 = vmul.f32 %v108_v14, %v97_v18  ;;  %v113_v30 = vmul.f32 %v104_v13, %v99_v22 }
  0x7b   :  { %v820_v13 = vmul.f32 %v818_v55, %v2266_v1 }
  0x7c   :  { %v64_v28 = vpop.permute.xlu1 %63  ;;  %2023 = vmatprep.subr.msk.mxu0 %vm119_vm1, %v112_v24  ;;  %v60_v29 = vpop.permute.xlu0 %59  ;;  %v1004_v24 = vrot.slane %v46_v17, %v2310_v9 }
  0x7d   :  { %v69_v31 = vsel %vm67_vm2, %v60_v29, %v64_v28  ;;  %v71_v32 = vsel %vm67_vm2, %v64_v28, %v60_v29  ;;  %2024 = vmatpush1.msk.msra.mxu0 %vm119_vm1, %v111_v23 }
  0x7e   :  { %v85_v34 = vmul.f32 %v76_v21, %v71_v32  ;;  %2025 = vmatmul.mubr.msk.f32.vlgmr.msra.gmra.mrb[0].mxu0 %vm115_vm3, %v33_v26  ;;  %2026 = vmatprep.subr.msk.mxu0 %vm119_vm1, %v114_v27  ;;  %v86_v35 = vmul.f32 %v80_v25, %v69_v31  ;;  %v36_v31 = vld [vmem:[%s2615_s1 + $0x20] sm:$0xff] }
  0x7f   :  { %2027 = vmatpush1.msk.msra.mxu0 %vm119_vm1, %v113_v30  ;;  %267 = vmatprep.mubr.f32.mxu0 %v2201_v4 }
  0x80   :  { %v62_v38 = vpop.permute.xlu1 %61  ;;  %2032 = vmatprep.subr.msk.mxu1 %vm119_vm1, %v86_v35  ;;  %v58_v39 = vpop.permute.xlu0 %57 }
  0x81   :  { %v68_v41 = vsel %vm67_vm2, %v58_v39, %v62_v38  ;;  %v70_v42 = vsel %vm67_vm2, %v62_v38, %v58_v39  ;;  %2033 = vmatpush1.msk.msra.mxu1 %vm119_vm1, %v85_v34  ;;  %v1193_v39 = vrot.slane %v47_v33, %v2310_v9 }
  0x82   :  { %v83_v45 = vmul.f32 %v76_v21, %v70_v42  ;;  %v84_v46 = vmul.f32 %v80_v25, %v68_v41  ;;  %2028 = vmatmul.mubr.msk.f32.vlgmr.msra.gmra.mrb[2].mxu0 %vm115_vm3, %v33_v26  ;;  %2034 = vmatmul.mubr.msk.f32.vlgmr.msra.gmra.mrb[0].mxu1 %vm115_vm3, %v32_v37  ;;  %v823_v21 = vcombine.high %v820_v13, %v820_v13 }
  0x83   :  { %347 = vmatprep.mubr.f32.mxu0 %v2201_v4  ;;  %609 = vmatprep.mubr.f32.mxu1 %v2201_v4  ;;  %v1000_v25 = vrot.slane %v46_v17, %v2307_v8  ;;  %v1189_v41 = vrot.slane %v47_v33, %v2307_v8 }
  0x84   :  { %v438_v48 = vpop.permute.xlu1 %437  ;;  %2029 = vmatprep.subr.msk.mxu0 %vm119_vm1, %v84_v46  ;;  %v434_v49 = vpop.permute.xlu0 %433 }
  0x85   :  { %v441_v50 = vsel %vm439_vm4, %v434_v49, %v438_v48  ;;  %v443_v51 = vsel %vm439_vm4, %v438_v48, %v434_v49  ;;  %2030 = vmatpush1.msk.msra.mxu0 %vm119_vm1, %v83_v45  ;;  %v48_v49 = vld [vmem:[%s2617_s3 + $0xe] sm:$0x3] }
  0x86   :  { %v457_v52 = vmul.f32 %v448_v40, %v443_v51  ;;  %v458_v53 = vmul.f32 %v452_v43, %v441_v50  ;;  %2031 = vmatmul.mubr.msk.f32.vlgmr.msra.gmra.mrb[0].mxu0 %vm115_vm3, %v32_v37  ;;  %v1382_v55 = vrot.slane %v48_v49, %v2310_v9 }
  0x87   :  { %532 = vmatprep.mubr.f32.mxu0 %v2201_v4 }
  0x88   :  { %v436_v57 = vpop.permute.xlu1 %435  ;;  %2038 = vmatprep.subr.msk.mxu1 %vm119_vm1, %v458_v53  ;;  %v432_v58 = vpop.permute.xlu0 %431 }
  0x89   :  { %v440_v59 = vsel %vm439_vm4, %v432_v58, %v436_v57  ;;  %v442_v60 = vsel %vm439_vm4, %v436_v57, %v432_v58  ;;  %2039 = vmatpush1.msk.msra.mxu1 %vm119_vm1, %v457_v52  ;;  %v1378_v57 = vrot.slane %v48_v49, %v2307_v8 }
  0x8a   :  { %v455_v62 = vmul.f32 %v448_v40, %v442_v60  ;;  %v456_v63 = vmul.f32 %v452_v43, %v440_v59  ;;  %2040 = vmatmul.mubr.msk.f32.vlgmr.msra.gmra.mrb[0].mxu1 %vm115_vm3, %v34_v56 }
  0x8b   :  { %798 = vmatprep.mubr.f32.mxu1 %v2201_v4 }
  0x8c   :  { %v627_v5 = vpop.permute.xlu1 %626  ;;  %2035 = vmatprep.subr.msk.mxu0 %vm119_vm1, %v456_v63  ;;  %v623_v10 = vpop.permute.xlu0 %622  ;;  %v38_v63 = vld [vmem:[%s2615_s1 + $0x30] sm:$0xff] }
  0x8d   :  { %v630_v11 = vsel %vm628_vm5, %v623_v10, %v627_v5  ;;  %v632_v12 = vsel %vm628_vm5, %v627_v5, %v623_v10  ;;  %2036 = vmatpush1.msk.msra.mxu0 %vm119_vm1, %v455_v62 }
  0x8e   :  { %v646_v14 = vmul.f32 %v637_v61, %v632_v12  ;;  %v647_v15 = vmul.f32 %v641_v2, %v630_v11  ;;  %2037 = vmatmul.mubr.msk.f32.vlgmr.msra.gmra.mrb[0].mxu0 %vm115_vm3, %v34_v56 }
  0x8f   :  { %721 = vmatprep.mubr.f32.mxu0 %v2201_v4 }
  0x90   :  { %v625_v18 = vpop.permute.xlu1 %624  ;;  %2044 = vmatprep.subr.msk.mxu1 %vm119_vm1, %v647_v15  ;;  %v621_v19 = vpop.permute.xlu0 %620 }
  0x91   :  { %v629_v1 = vsel %vm628_vm5, %v621_v19, %v625_v18  ;;  %v631_v20 = vsel %vm628_vm5, %v625_v18, %v621_v19  ;;  %2045 = vmatpush1.msk.msra.mxu1 %vm119_vm1, %v646_v14 }
  0x92   :  { %v644_v22 = vmul.f32 %v637_v61, %v631_v20  ;;  %v645_v23 = vmul.f32 %v641_v2, %v629_v1  ;;  %2046 = vmatmul.mubr.msk.f32.vlgmr.msra.gmra.mrb[0].mxu1 %vm115_vm3, %v35_v16  ;;  %2050 = vmatprep.subr.msk.mxu1 %vm119_vm1, %v903_v0  ;;  %v39_v20 = vld [vmem:[%s2615_s1 + $0x38] sm:$0xff] }
  0x93   :  { %2051 = vmatpush1.msk.msra.mxu1 %vm119_vm1, %v821_v3  ;;  %972 = vmatprep.mubr.f32.mxu1 %v2201_v4  ;;  %v49_v3 = vld [vmem:[%s2617_s3 + $0x10] sm:$0x3] }
  0x94   :  { %2041 = vmatprep.subr.msk.mxu0 %vm119_vm1, %v645_v23  ;;  %v990_v26 = vpop.permute.xlu1 %989  ;;  %v986_v27 = vpop.permute.xlu0 %985  ;;  %v1571_v14 = vrot.slane %v49_v3, %v2310_v9  ;;  %v1567_v0 = vrot.slane %v49_v3, %v2307_v8 }
  0x95   :  { %2042 = vmatpush1.msk.msra.mxu0 %vm119_vm1, %v644_v22  ;;  %v993_v28 = vsel %vm991_vm6, %v986_v27, %v990_v26  ;;  %v995_v29 = vsel %vm991_vm6, %v990_v26, %v986_v27 }
  0x96   :  { %2043 = vmatmul.mubr.msk.f32.vlgmr.msra.gmra.mrb[0].mxu0 %vm115_vm3, %v35_v16  ;;  %v1010_v30 = vmul.f32 %v1004_v24, %v995_v29  ;;  %2047 = vmatprep.subr.msk.mxu0 %vm119_vm1, %v823_v21  ;;  %v1009_v32 = vmul.f32 %v1000_v25, %v993_v28  ;;  %v40_v28 = vld [vmem:[%s2615_s1 + $0x40] sm:$0xff] }
  0x97   :  { %2048 = vmatpush1.msk.msra.mxu0 %vm119_vm1, %v820_v13  ;;  %895 = vmatprep.mubr.f32.mxu0 %v2201_v4  ;;  %v1787_v29 = vld [vmem:[%s2616_s2] sm:$0xff] }
  0x98   :  { %v988_v34 = vpop.permute.xlu1 %987  ;;  %2056 = vmatprep.subr.msk.mxu1 %vm119_vm1, %v1010_v30  ;;  %v984_v35 = vpop.permute.xlu0 %983  ;;  %v2209_v30 = vmov 0  }
  0x99   :  { %v992_v36 = vsel %vm991_vm6, %v984_v35, %v988_v34  ;;  %v994_v37 = vsel %vm991_vm6, %v988_v34, %v984_v35  ;;  %2173 = vset.pattern.permute.xlu0 %v2209_v30 }
  0x9a   :  { %2052 = vmatmul.mubr.msk.f32.vlgmr.msra.gmra.mrb[0].mxu1 %vm115_vm3, %v36_v31  ;;  %v1008_v38 = vmul.f32 %v1004_v24, %v994_v37  ;;  %v1007_v40 = vmul.f32 %v1000_v25, %v992_v36  ;;  %1790 = vperm.xlu0 %2173, %v1787_v29  }
  0x9b   :  { %2057 = vmatpush1.msk.msra.mxu1 %vm119_vm1, %v1009_v32  ;;  %1161 = vmatprep.mubr.f32.mxu1 %v2201_v4 }
  0x9c   :  { %v1179_v42 = vpop.permute.xlu1 %1178  ;;  %2053 = vmatprep.subr.msk.mxu0 %vm119_vm1, %v1008_v38  ;;  %v1175_v43 = vpop.permute.xlu0 %1174 }
  0x9d   :  { %v1182_v44 = vsel %vm1180_vm7, %v1175_v43, %v1179_v42  ;;  %v1184_v45 = vsel %vm1180_vm7, %v1179_v42, %v1175_v43 }
  0x9e   :  { %2049 = vmatmul.mubr.msk.f32.vlgmr.msra.gmra.mrb[0].mxu0 %vm115_vm3, %v36_v31  ;;  %v1199_v46 = vmul.f32 %v1193_v39, %v1184_v45  ;;  %v1198_v48 = vmul.f32 %v1189_v41, %v1182_v44 }
  0x9f   :  { %2054 = vmatpush1.msk.msra.mxu0 %vm119_vm1, %v1007_v40  ;;  %1084 = vmatprep.mubr.f32.mxu0 %v2201_v4 }
  0xa0   :  { %v1177_v50 = vpop.permute.xlu1 %1176  ;;  %2062 = vmatprep.subr.msk.mxu1 %vm119_vm1, %v1199_v46  ;;  %v1173_v51 = vpop.permute.xlu0 %1172 }
  0xa1   :  { %v1181_v52 = vsel %vm1180_vm7, %v1173_v51, %v1177_v50  ;;  %v1183_v53 = vsel %vm1180_vm7, %v1177_v50, %v1173_v51 }
  0xa2   :  { %2058 = vmatmul.mubr.msk.f32.vlgmr.msra.gmra.mrb[0].mxu1 %vm115_vm3, %v37_v47  ;;  %v1197_v54 = vmul.f32 %v1193_v39, %v1183_v53  ;;  %v1196_v56 = vmul.f32 %v1189_v41, %v1181_v52 }
  0xa3   :  { %2063 = vmatpush1.msk.msra.mxu1 %vm119_vm1, %v1198_v48  ;;  %1350 = vmatprep.mubr.f32.mxu1 %v2201_v4 }
  0xa4   :  { %v1368_v58 = vpop.permute.xlu1 %1367  ;;  %2059 = vmatprep.subr.msk.mxu0 %vm119_vm1, %v1197_v54  ;;  %v1364_v59 = vpop.permute.xlu0 %1363 }
  0xa5   :  { %v1371_v60 = vsel %vm1369_vm8, %v1364_v59, %v1368_v58  ;;  %v1373_v61 = vsel %vm1369_vm8, %v1368_v58, %v1364_v59 }
  0xa6   :  { %2055 = vmatmul.mubr.msk.f32.vlgmr.msra.gmra.mrb[0].mxu0 %vm115_vm3, %v37_v47  ;;  %v1388_v62 = vmul.f32 %v1382_v55, %v1373_v61  ;;  %v1387_v2 = vmul.f32 %v1378_v57, %v1371_v60 }
  0xa7   :  { %2060 = vmatpush1.msk.msra.mxu0 %vm119_vm1, %v1196_v56  ;;  %1273 = vmatprep.mubr.f32.mxu0 %v2201_v4 }
  0xa8   :  { %v1366_v5 = vpop.permute.xlu1 %1365  ;;  %2068 = vmatprep.subr.msk.mxu1 %vm119_vm1, %v1388_v62  ;;  %v1362_v10 = vpop.permute.xlu0 %1361 }
  0xa9   :  { %v1370_v11 = vsel %vm1369_vm8, %v1362_v10, %v1366_v5  ;;  %v1372_v12 = vsel %vm1369_vm8, %v1366_v5, %v1362_v10 }
  0xaa   :  { %2064 = vmatmul.mubr.msk.f32.vlgmr.msra.gmra.mrb[0].mxu1 %vm115_vm3, %v38_v63  ;;  %v1386_v13 = vmul.f32 %v1382_v55, %v1372_v12  ;;  %v1385_v15 = vmul.f32 %v1378_v57, %v1370_v11  ;;  %v50_v55 = vld [vmem:[%s2617_s3 + $0x12] sm:$0x3] }
  0xab   :  { %2069 = vmatpush1.msk.msra.mxu1 %vm119_vm1, %v1387_v2  ;;  %1539 = vmatprep.mubr.f32.mxu1 %v2201_v4  ;;  %v1805_v2 = vrot.slane %v50_v55, %v2307_v8  ;;  %v1809_v3 = vrot.slane %v50_v55, %v2310_v9 }
  0xac   :  { %v1557_v16 = vpop.permute.xlu1 %1556  ;;  %2065 = vmatprep.subr.msk.mxu0 %vm119_vm1, %v1386_v13  ;;  %v1553_v17 = vpop.permute.xlu0 %1552 }
  0xad   :  { %v1560_v18 = vsel %vm1558_vm9, %v1553_v17, %v1557_v16  ;;  %v1562_v19 = vsel %vm1558_vm9, %v1557_v16, %v1553_v17 }
  0xae   :  { %2061 = vmatmul.mubr.msk.f32.vlgmr.msra.gmra.mrb[0].mxu0 %vm115_vm3, %v38_v63  ;;  %v1577_v1 = vmul.f32 %v1571_v14, %v1562_v19  ;;  %v1576_v21 = vmul.f32 %v1567_v0, %v1560_v18 }
  0xaf   :  { %2066 = vmatpush1.msk.msra.mxu0 %vm119_vm1, %v1385_v15  ;;  %1462 = vmatprep.mubr.f32.mxu0 %v2201_v4 }
  0xb0   :  { %2074 = vmatprep.subr.msk.mxu1 %vm119_vm1, %v1577_v1  ;;  %v1555_v22 = vpop.permute.xlu1 %1554  ;;  %v1551_v23 = vpop.permute.xlu0 %1550 }
  0xb1   :  { %v1559_v24 = vsel %vm1558_vm9, %v1551_v23, %v1555_v22  ;;  %v1561_v25 = vsel %vm1558_vm9, %v1555_v22, %v1551_v23 }
  0xb2   :  { %2070 = vmatmul.mubr.msk.f32.vlgmr.msra.gmra.mrb[0].mxu1 %vm115_vm3, %v39_v20  ;;  %v1575_v26 = vmul.f32 %v1571_v14, %v1561_v25  ;;  %v1574_v27 = vmul.f32 %v1567_v0, %v1559_v24 }
  0xb3   :  { %2075 = vmatpush1.msk.msra.mxu1 %vm119_vm1, %v1576_v21  ;;  %1728 = vmatprep.mubr.f32.mxu1 %v2201_v4 }
  0xb4   :  { %2071 = vmatprep.subr.msk.mxu0 %vm119_vm1, %v1575_v26 }
  0xb6   :  { %2067 = vmatmul.mubr.msk.f32.vlgmr.msra.gmra.mrb[0].mxu0 %vm115_vm3, %v39_v20 }
  0xb7   :  { %2072 = vmatpush1.msk.msra.mxu0 %vm119_vm1, %v1574_v27  ;;  %1651 = vmatprep.mubr.f32.mxu0 %v2201_v4 }
  0xb8   :  { %2092 = vmatprep.subr.mxu0 %v2201_v4 }
  0xba   :  { %2076 = vmatmul.mubr.msk.f32.vlgmr.msra.gmra.mrb[0].mxu1 %vm115_vm3, %v40_v28 }
  0xbb   :  { %2113 = vmatprep.mubr.msk.f32.mxu1 %vm2210_vm10, %v2201_v4 }
  0xbe   :  { %2073 = vmatmul.mubr.msk.f32.vlgmr.msra.gmra.mrb[0].mxu0 %vm115_vm3, %v40_v28 }
  0xbf   :  { %2094 = vmatprep.mubr.msk.f32.mxu0 %vm2210_vm10, %v2201_v4 }
 0x119   :  { %v1791_v39 = vpop.permute.xlu0 %1790 }
 0x155   :  { %v269_v31 = vpop.f32.mrb[2].mxu0 }
 0x156   :  { %v271_v32 = vpop.f32.mrb[3].mxu0 }
 0x18d   :  { %v1730_v33 = vpop.f32.mrb[0].mxu1 }
 0x18e   :  { %v2128_v34 = vadd.f32 %v1730_v33, %v269_v31  ;;  %v1732_v35 = vpop.f32.mrb[1].mxu1  ;;  %v1918_v33 = vld [vmem:[%s2620_s6] sm:$0xff] }
 0x18f   :  { %v2129_v36 = vadd.f32 %v1732_v35, %v271_v32  ;;  %v1824_v32 = vld [vmem:[%s2618_s4] sm:$0xff]  ;;  %v1920_v35 = vld [vmem:[%s2620_s6 + $0x10] sm:$0xff] }
 0x190   :  { %1741 = vrot.lane.b32.xlu1 %v2128_v34, %s2205_s12  ;;  %2093 = vmatpush3.msra.mxu0 %v1824_v32 }
 0x191   :  { %v1653_v37 = vpop.f32.mrb[0].mxu0 }
 0x192   :  { %1755 = vrot.lane.b32.xlu0 %v1653_v37, %s2207_s14  ;;  %v1655_v38 = vpop.f32.mrb[1].mxu0 }
 0x194   :  { %1757 = vrot.lane.b32.xlu1 %v2128_v34, %s2207_s14 }
 0x196   :  { %1767 = vrot.lane.b32.xlu0 %v1653_v37, %s2208_s15 }
 0x198   :  { %1769 = vrot.lane.b32.xlu1 %v2128_v34, %s2208_s15 }
 0x19a   :  { %1743 = vrot.lane.b32.xlu0 %v1655_v38, %s2205_s12 }
 0x19c   :  { %1745 = vrot.lane.b32.xlu1 %v2129_v36, %s2205_s12 }
 0x19e   :  { %1759 = vrot.lane.b32.xlu0 %v1655_v38, %s2207_s14 }
 0x1a0   :  { %1761 = vrot.lane.b32.xlu1 %v2129_v36, %s2207_s14 }
 0x1a2   :  { %1771 = vrot.lane.b32.xlu0 %v1655_v38, %s2208_s15 }
 0x1a4   :  { %1739 = vrot.lane.b32.xlu1 %v1653_v37, %s2205_s12 }
 0x1a8   :  { %1773 = vrot.lane.b32.xlu1 %v2129_v36, %s2208_s15 }
 0x202   :  { %v1742_v40 = vpop.permute.xlu1 %1741 }
 0x204   :  { %v1756_v41 = vpop.permute.xlu0 %1755 }
 0x206   :  { %v1758_v42 = vpop.permute.xlu1 %1757 }
 0x208   :  { %v1768_v43 = vpop.permute.xlu0 %1767 }
 0x20a   :  { %v1770_v44 = vpop.permute.xlu1 %1769 }
 0x20c   :  { %v1744_v45 = vpop.permute.xlu0 %1743 }
 0x20e   :  { %v1746_v46 = vpop.permute.xlu1 %1745 }
 0x20f   :  { %v1748_v52 = vsel %vm991_vm6, %v1742_v40, %v1746_v46  ;;  %v1750_v53 = vsel %vm991_vm6, %v1746_v46, %v1742_v40  ;;  %v1923_v40 = vld [vmem:[%s2620_s6 + $0x28] sm:$0xff] }
 0x210   :  { %v1760_v47 = vpop.permute.xlu0 %1759  ;;  %v1753_v5 = vmax.f32 %v2128_v34, %v1748_v52  ;;  %v1754_v10 = vmax.f32 %v2129_v36, %v1750_v53  ;;  %v1919_v34 = vld [vmem:[%s2620_s6 + $0x8] sm:$0xff]  ;;  %v2211_v36 = vmov 0.0|0.0  }
 0x211   :  { %v1763_v56 = vsel %vm1369_vm8, %v1756_v41, %v1760_v47  ;;  %v1765_v57 = vsel %vm1369_vm8, %v1760_v47, %v1756_v41  ;;  %2116 = vmatprep.subr.bf16.mxu1 %v2211_v36 }
 0x212   :  { %v1762_v48 = vpop.permute.xlu1 %1761 }
 0x213   :  { %v1764_v14 = vsel %vm1369_vm8, %v1758_v42, %v1762_v48  ;;  %v1766_v15 = vsel %vm1369_vm8, %v1762_v48, %v1758_v42 }
 0x214   :  { %v1772_v49 = vpop.permute.xlu0 %1771 }
 0x215   :  { %v1775_v50 = vsel %vm1558_vm9, %v1768_v43, %v1772_v49  ;;  %v1777_v51 = vsel %vm1558_vm9, %v1772_v49, %v1768_v43  ;;  %v1836_v43 = vsub.s32 %v2304_v7, %v2302_v6  ;;  %v2077_v6 = vld [vmem:[%s2619_s5] ss:$0 sm:$0xff] }
 0x216   :  { %v1740_v54 = vpop.permute.xlu1 %1739  ;;  %v1779_v60 = vmax.f32 %v1763_v56, %v1775_v50  ;;  %v1780_v61 = vmax.f32 %v1765_v57, %v1777_v51  ;;  %v1924_v50 = vld [vmem:[%s2620_s6 + $0x30] sm:$0xff]  ;;  %v1925_v51 = vld [vmem:[%s2620_s6 + $0x38] sm:$0xff]  ;;  %v2079_v56 = vld [vmem:[%s2621_s7] ss:$0 sm:$0xff] }
 0x217   :  { %v1747_v58 = vsel %vm991_vm6, %v1740_v54, %v1744_v45  ;;  %v1749_v59 = vsel %vm991_vm6, %v1744_v45, %v1740_v54  ;;  %v2126_v52 = vpack.c.bf16 %v1925_v51, %v1924_v50 }
 0x218   :  { %v1751_v62 = vmax.f32 %v1653_v37, %v1747_v58  ;;  %v1752_v63 = vmax.f32 %v1655_v38, %v1749_v59  ;;  %v2117_v37 = vpack.c.bf16 %v1919_v34, %v1918_v33  ;;  %v1921_v38 = vld [vmem:[%s2620_s6 + $0x18] sm:$0xff] }
 0x219   :  { %v2120_v4 = vpack.c.bf16 %v1921_v38, %v1920_v35 }
 0x21a   :  { %v1783_v11 = vmax.f32 %v1751_v62, %v1779_v60  ;;  %v1784_v12 = vmax.f32 %v1752_v63, %v1780_v61  ;;  %v1774_v13 = vpop.permute.xlu1 %1773  ;;  %2118 = vmatpush3.bf16.msra.mxu1 %v2117_v37 }
 0x21b   :  { %v1776_v0 = vsel %vm1558_vm9, %v1770_v44, %v1774_v13  ;;  %v1778_v16 = vsel %vm1558_vm9, %v1774_v13, %v1770_v44  ;;  %2119 = vmatprep.subr.bf16.mxu1 %v2211_v36 }
 0x21c   :  { %v1781_v8 = vmax.f32 %v1764_v14, %v1776_v0  ;;  %v1782_v17 = vmax.f32 %v1766_v15, %v1778_v16  ;;  %v1793_v9 = vadd.f32 %v1791_v39, %v1783_v11  ;;  %v1794_v18 = vadd.f32 %v1791_v39, %v1784_v12 }
 0x21e   :  { %v1785_v19 = vmax.f32 %v1753_v5, %v1781_v8  ;;  %v1786_v1 = vmax.f32 %v1754_v10, %v1782_v17  ;;  %v1797_v20 = vmax.f32 %v1793_v9, 0.0  ;;  %v1798_v21 = vmax.f32 %v1794_v18, 0.0  ;;  %2121 = vmatpush3.bf16.msra.mxu1 %v2120_v4 }
 0x21f   :  { %2122 = vmatprep.subr.bf16.mxu1 %v2211_v36 }
 0x220   :  { %v1812_v22 = vmul.f32 %v1805_v2, %v1797_v20  ;;  %v1813_v23 = vmul.f32 %v1809_v3, %v1798_v21  ;;  %v1795_v24 = vadd.f32 %v1791_v39, %v1785_v19  ;;  %v1796_v25 = vadd.f32 %v1791_v39, %v1786_v1  ;;  %v1922_v39 = vld [vmem:[%s2620_s6 + $0x20] sm:$0xff]  ;;  %s2176_s6 = scalar_lea.vmem %s2016_s0, 32 }
 0x221   :  { %v2123_v41 = vpack.c.bf16 %v1923_v40, %v1922_v39  ;;  %p2177_p0 = scmp.ne.s32.totalorder %s2016_s0, %s2176_s6  ;;  %p2182_p2 = scmp.lt.s32.totalorder %s2176_s6, %s2176_s6 }
 0x222   :  { %v1816_v26 = vadd.f32 %v1813_v23, %v1812_v22  ;;  %v1799_v27 = vmax.f32 %v1795_v24, 0.0  ;;  %v1800_v28 = vmax.f32 %v1796_v25, 0.0 }
 0x223   :  { %2124 = vmatpush3.bf16.msra.mxu1 %v2123_v41  ;;  %p2183_p3 = por %p2182_p2, %p2181_p1 }
 0x224   :  { %1817 = vadd.xlane.f32.xlu0 %v1816_v26  ;;  %v1814_v29 = vmul.f32 %v1805_v2, %v1799_v27  ;;  %v1815_v30 = vmul.f32 %v1809_v3, %v1800_v28  ;;  %2125 = vmatprep.subr.bf16.mxu1 %v2211_v36 }
 0x225   :  { %p2184_p4 = pnand %p2183_p3, %p2177_p0 }
 0x226   :  { %v1819_v31 = vadd.f32 %v1815_v30, %v1814_v29 }
 0x227   :  { %2127 = vmatpush3.bf16.msra.mxu1 %v2126_v52 }
 0x228   :  { %1820 = vadd.xlane.f32.xlu1 %v1819_v31 }
 0x2b1   :  { %v1818_v42 = vpop.xlane.xlu0 %1817 }
 0x2b2   :  { %v1822_v44 = vmul.f32 0.015625, %v1818_v42 }
 0x2b4   :  { %v1837_v47 = vrot.slane %v1822_v44, %v1836_v43 }
 0x2b5   :  { %v1821_v45 = vpop.xlane.xlu1 %1820 }
 0x2b6   :  { %v1823_v46 = vmul.f32 0.015625, %v1821_v45 }
 0x2b8   :  { %v1841_v48 = vrot.slane %v1823_v46, %v1836_v43 }
 0x2ba   :  { %v1843_v49 = vsel %vm1842_vm11, %v1841_v48, %v1837_v47 }
 0x2bb   :  { %2095 = vmatmul.mubr.msk.f32.vlgmr.msra.gmra.mrb[4].mxu0 %vm1844_vm12, %v1843_v49 }
 0x38e   :  { %v1913_v7 = vpop.f32.mrb[4].mxu0 }
 0x38f   :  { %v1914_v53 = vadd.f32 %v2077_v6, %v1913_v7  ;;  %v2096_v54 = vpop.f32.mrb[5].mxu0 }
 0x391   :  { %v1917_v55 = vmax.f32 %v1914_v53, 0.0 }
 0x393   :  { %2114 = vmatmul.mubr.msk.f32.vlgmr.msra.gmra.mrb[2].mxu1 %vm1933_vm13, %v1917_v55 }
 0x466   :  { %v2003_v57 = vpop.f32.mrb[2].mxu1 }
 0x467   :  { %v2004_v58 = vadd.f32 %v2079_v56, %v2003_v57  ;;  %v2115_v59 = vpop.f32.mrb[3].mxu1 }
 0x469   :  { %2008 = vst.msk [vmem:[#allocation2] sm:$0x3] %vm2007_vm14, %v2004_v58 }
 0x46a   :  { %2187 = shalt.err (!%p2184_p4)
}
 0x46b   :  { %s2188_s1 = scalar_lea.hbm %s2622_s8, 32 }
 0x46c   :  { %p2189_p5 = scmp.ne.s32.totalorder %s2622_s8, %s2188_s1  ;;  %p2192_p6 = scmp.lt.u32.totalorder %s2188_s1, %s2622_s8 }
 0x46e   :  { %p2194_p7 = pnand %p2192_p6, %p2189_p5 }
 0x470   :  { %2197 = shalt.err (!%p2194_p7)
}
 0x471   :  { %2018 = dma.vmem_to_hbm [thread:$0]  %s2016_s0, 32, %s2622_s8, [#allocation3]  }
 0x472   :  { %2198 = dma.done.wait [#allocation3], 32  }
 0x473   :  { %2199 = vsyncadd [#allocation3], 4294967264 }
 0x474   :  { %2022 = vsyncpa [#allocation3], 1 }

</bundles_post_ra>
